<compile_context>
chip_gen: v7x
topology: tpu7x:2x2x1
jax: 0.10.0
libtpu: 0.0.40
codegen_flags: <defaults>
</compile_context>

<pallas_src>
import functools

import jax
import jax.numpy as jnp
from jax.experimental import pallas as pl
from jax.experimental.pallas import tpu as pltpu

VMEM_SPEC = pl.BlockSpec(memory_space=pltpu.MemorySpace.VMEM)
CORE_SPLIT = 2  # leading 'parallel' grid axis (2 TensorCores on v7x; sequential elsewhere)


def _round_up(x, m):
    return ((x + m - 1) // m) * m


# ---------------------------------------------------------------------------
# Kernel 1 (per branch): streaming reduction
#   out[c, g, :] += sum over items n in this core's tiles with batch[n]==g of
#                   sum_e x[e, n, :]
# x is streamed bf16 as [E, N_pad, H]; batch ids are int32 [1, N_pad] (padded
# rows carry -1 and match no graph).  The ensemble/segment mean scales
# (1 / (E * count_g)) are applied later in the head kernel.
# ---------------------------------------------------------------------------
def _branch_pool_kernel(batch_ref, x_ref, o_ref):
    @pl.when(pl.program_id(1) == 0)
    def _():
        o_ref[...] = jnp.zeros_like(o_ref)

    x = x_ref[...].astype(jnp.float32)                 # [E, tile_n, H]
    xs = jnp.sum(x, axis=0)                            # [tile_n, H] (VPU adds)

    batch = batch_ref[...]                             # [1, tile_n] int32
    g_pad = o_ref.shape[0]
    gids = jax.lax.broadcasted_iota(jnp.int32, (g_pad, batch.shape[1]), 0)
    assign = (batch == gids).astype(jnp.float32)       # [G_pad, tile_n] one-hot

    # Segment-sum via MXU matmul, accumulated into the resident output block.
    o_ref[...] += jnp.dot(assign, xs, preferred_element_type=jnp.float32)


def _branch_pool(x, batch_ids, g_pad, *, tile_n, stream_dtype):
    """x: [N, E, H]; batch_ids: int32 [N] (or [1,N]).  Returns ([2,G_pad,H], [G_pad,1])."""
    n, e, h = x.shape
    t = min(tile_n, _round_up(n, 128))                 # lane-aligned tile of items
    n_pad = _round_up(n, CORE_SPLIT * t)
    inner = n_pad // (CORE_SPLIT * t)

    # Layout + dtype plumbing (one-time XLA ops, outside the hot loop):
    xt = jnp.transpose(x, (1, 0, 2)).astype(stream_dtype)      # [E, N, H]
    xt = jnp.pad(xt, ((0, 0), (0, n_pad - n), (0, 0)))
    b_flat = batch_ids.reshape(-1).astype(jnp.int32)
    b = jnp.pad(b_flat.reshape(1, n), ((0, 0), (0, n_pad - n)), constant_values=-1)

    sums = pl.pallas_call(
        _branch_pool_kernel,
        out_shape=jax.ShapeDtypeStruct((CORE_SPLIT, g_pad, h), jnp.float32),
        grid=(CORE_SPLIT, inner),
        in_specs=[
            pl.BlockSpec((1, t), lambda c, i: (0, c * inner + i)),
            pl.BlockSpec((e, t, h), lambda c, i: (0, c * inner + i, 0)),
        ],
        out_specs=pl.BlockSpec((None, g_pad, h), lambda c, i: (c, 0, 0)),
        compiler_params=pltpu.CompilerParams(
            dimension_semantics=("parallel", "arbitrary")),
    )(b, xt)

    # Global per-graph counts (computed once; never per-tile).
    counts = jnp.zeros((g_pad,), jnp.float32).at[b_flat].add(1.0)
    inv = (1.0 / (e * jnp.maximum(counts, 1.0))).reshape(g_pad, 1)
    return sums, inv


# ---------------------------------------------------------------------------
# Kernel 2: epilogue head.  Combines the per-core partial sums, applies the
# mean scales, the two branch Linear heads and the final Linear(2H, OUT)
# without any concatenate (split-weight form).
# ---------------------------------------------------------------------------
def _head_kernel(sb_ref, sc_ref, ib_ref, ic_ref,
                 wb_ref, bb_ref, wc_ref, bc_ref,
                 wob_ref, woc_ref, bo_ref, o_ref):
    pooled_b = jnp.sum(sb_ref[...], axis=0) * ib_ref[...]       # [G_pad, H]
    pooled_c = jnp.sum(sc_ref[...], axis=0) * ic_ref[...]       # [G_pad, H]
    yb = jnp.dot(pooled_b, wb_ref[...], preferred_element_type=jnp.float32) + bb_ref[...]
    yc = jnp.dot(pooled_c, wc_ref[...], preferred_element_type=jnp.float32) + bc_ref[...]
    out = (jnp.dot(yb, wob_ref[...], preferred_element_type=jnp.float32)
           + jnp.dot(yc, woc_ref[...], preferred_element_type=jnp.float32)
           + bo_ref[...])
    o_ref[...] = out


# ---------------------------------------------------------------------------
# Predictor forward (pred_target='both')
# ---------------------------------------------------------------------------
@functools.partial(jax.jit, static_argnames=("num_graphs", "tile_n"))
def predictor_forward(params, node_embedding, centroid_embedding,
                      node_batch, centroid_batch, num_graphs,
                      *, tile_n=512):
    # TODO(synk): pred_target is fixed to 'both'; 'base'/'centroid' would just
    # drop one branch and use a single-width final head.
    h = params["w_base"].shape[0]
    out_dim = params["w_out"].shape[1]
    g_pad = _round_up(max(num_graphs, 1), 8)
    stream_dtype = jnp.bfloat16  # bf16 streaming of the mem-bound [N,E,H] reads

    sum_b, inv_b = _branch_pool(node_embedding, node_batch, g_pad,
                                tile_n=tile_n, stream_dtype=stream_dtype)
    sum_c, inv_c = _branch_pool(centroid_embedding, centroid_batch, g_pad,
                                tile_n=tile_n, stream_dtype=stream_dtype)

    w_out_b = params["w_out"][:h, :]
    w_out_c = params["w_out"][h:, :]

    out = pl.pallas_call(
        _head_kernel,
        out_shape=jax.ShapeDtypeStruct((g_pad, out_dim), jnp.float32),
        in_specs=[VMEM_SPEC] * 11,
        out_specs=VMEM_SPEC,
    )(sum_b, sum_c, inv_b, inv_c,
      params["w_base"], params["b_base"],
      params["w_cent"], params["b_cent"],
      w_out_b, w_out_c, params["b_out"])

    return out[:num_graphs, :]


# ---------------------------------------------------------------------------
# Pure-JAX reference (module-order semantics: mean_E -> Linear -> segment mean
# -> concat -> Linear), using the same bf16 input streaming as the kernel.
# ---------------------------------------------------------------------------
def predictor_reference(params, node_embedding, centroid_embedding,
                        node_batch, centroid_batch, num_graphs):
    def branch(x, w, b, batch):
        x = x.astype(jnp.bfloat16).astype(jnp.float32)
        xm = jnp.mean(x, axis=1)                                  # ensemble mean
        y = xm @ w + b                                            # per-item Linear
        batch = batch.reshape(-1)
        gids = jnp.arange(num_graphs)[:, None]
        assign = (batch[None, :] == gids).astype(jnp.float32)
        counts = jnp.maximum(assign.sum(axis=1, keepdims=True), 1.0)
        return (assign @ y) / counts                              # segment mean

    gb = branch(node_embedding, params["w_base"], params["b_base"], node_batch)
    gc = branch(centroid_embedding, params["w_cent"], params["b_cent"], centroid_batch)
    cat = jnp.concatenate([gb, gc], axis=1)
    return cat @ params["w_out"] + params["b_out"]


if __name__ == "__main__":
    # small, module-consistent shapes
    N_NODES, N_CENT = 16, 8      # items
    E = 4                        # ensemble size
    H = 32                       # hidden
    OUT = 8                      # final prediction dim
    G = 2                        # number of graphs

    key = jax.random.PRNGKey(0)
    k1, k2, k3, k4, k5, k6, k7 = jax.random.split(key, 7)

    node_embedding = jax.random.normal(k1, (N_NODES, E, H), jnp.float32)
    centroid_embedding = jax.random.normal(k2, (N_CENT, E, H), jnp.float32)
    node_batch = jnp.concatenate(
        [jnp.zeros((N_NODES // 2,), jnp.int32),
         jnp.ones((N_NODES - N_NODES // 2,), jnp.int32)]).reshape(1, N_NODES)
    centroid_batch = jnp.concatenate(
        [jnp.zeros((N_CENT // 2,), jnp.int32),
         jnp.ones((N_CENT - N_CENT // 2,), jnp.int32)]).reshape(1, N_CENT)

    scale = 0.1
    params = {
        "w_base": scale * jax.random.normal(k3, (H, H), jnp.float32),
        "b_base": scale * jax.random.normal(k4, (1, H), jnp.float32),
        "w_cent": scale * jax.random.normal(k5, (H, H), jnp.float32),
        "b_cent": scale * jax.random.normal(k6, (1, H), jnp.float32),
        "w_out": scale * jax.random.normal(k7, (2 * H, OUT), jnp.float32),
        "b_out": jnp.zeros((1, OUT), jnp.float32),
    }

    out = predictor_forward(params, node_embedding, centroid_embedding,
                            node_batch, centroid_batch, G)
    out = jax.block_until_ready(out)

    ref = predictor_reference(params, node_embedding, centroid_embedding,
                              node_batch, centroid_batch, G)
    assert out.shape == (G, OUT), out.shape
    assert jnp.allclose(out, ref, atol=1e-2, rtol=1e-2), "mismatch vs reference"

    print("KERNEL_OK")
</pallas_src>

<mosaic_0001>
module attributes {stable_mosaic.version = 11 : i64} {
  func.func private @main(%arg0: i32) attributes {dimension_semantics = [#tpu.dimension_semantics<core_parallel>], iteration_bounds = array<i64: 2>, tpu.core_type = #tpu.core_type<sc_scalar_subcore>, window_params = []} {
    return
  }
}

module attributes {stable_mosaic.version = 11 : i64} {
  func.func private @main(%arg0: i32) attributes {dimension_semantics = [#tpu.dimension_semantics<core_parallel>], iteration_bounds = array<i64: 2>, tpu.core_type = #tpu.core_type<sc_scalar_subcore>, window_params = []} {
    return
  }
}

module attributes {stable_mosaic.version = 11 : i64} {
  func.func @_head_kernel(%arg0: memref<2x8x32xf32, #tpu.memory_space<vmem>>, %arg1: memref<2x8x32xf32, #tpu.memory_space<vmem>>, %arg2: memref<8x1xf32, #tpu.memory_space<vmem>>, %arg3: memref<8x1xf32, #tpu.memory_space<vmem>>, %arg4: memref<32x32xf32, #tpu.memory_space<vmem>>, %arg5: memref<1x32xf32, #tpu.memory_space<vmem>>, %arg6: memref<32x32xf32, #tpu.memory_space<vmem>>, %arg7: memref<1x32xf32, #tpu.memory_space<vmem>>, %arg8: memref<32x8xf32, #tpu.memory_space<vmem>>, %arg9: memref<32x8xf32, #tpu.memory_space<vmem>>, %arg10: memref<1x8xf32, #tpu.memory_space<vmem>>, %arg11: memref<8x8xf32, #tpu.memory_space<vmem>>) attributes {dimension_semantics = [], scalar_prefetch = 0 : i64, scratch_operands = 0 : i64, tpu.core_type = #tpu.core_type<tc>} {
    %c0 = arith.constant 0 : index
    %c0_0 = arith.constant 0 : index
    %c0_1 = arith.constant 0 : index
    %0 = vector.load %arg0[%c0, %c0_0, %c0_1] : memref<2x8x32xf32, #tpu.memory_space<vmem>>, vector<2x8x32xf32>
    %cst = arith.constant dense<0.000000e+00> : vector<8x32xf32>
    %1 = vector.multi_reduction <add>, %0, %cst [0] : vector<2x8x32xf32> to vector<8x32xf32>
    %c0_2 = arith.constant 0 : index
    %c0_3 = arith.constant 0 : index
    %2 = vector.load %arg2[%c0_2, %c0_3] : memref<8x1xf32, #tpu.memory_space<vmem>>, vector<8x1xf32>
    %3 = vector.broadcast %2 : vector<8x1xf32> to vector<8x32xf32>
    %4 = arith.mulf %1, %3 : vector<8x32xf32>
    %c0_4 = arith.constant 0 : index
    %c0_5 = arith.constant 0 : index
    %c0_6 = arith.constant 0 : index
    %5 = vector.load %arg1[%c0_4, %c0_5, %c0_6] : memref<2x8x32xf32, #tpu.memory_space<vmem>>, vector<2x8x32xf32>
    %cst_7 = arith.constant dense<0.000000e+00> : vector<8x32xf32>
    %6 = vector.multi_reduction <add>, %5, %cst_7 [0] : vector<2x8x32xf32> to vector<8x32xf32>
    %c0_8 = arith.constant 0 : index
    %c0_9 = arith.constant 0 : index
    %7 = vector.load %arg3[%c0_8, %c0_9] : memref<8x1xf32, #tpu.memory_space<vmem>>, vector<8x1xf32>
    %8 = vector.broadcast %7 : vector<8x1xf32> to vector<8x32xf32>
    %9 = arith.mulf %6, %8 : vector<8x32xf32>
    %c0_10 = arith.constant 0 : index
    %c0_11 = arith.constant 0 : index
    %10 = vector.load %arg4[%c0_10, %c0_11] : memref<32x32xf32, #tpu.memory_space<vmem>>, vector<32x32xf32>
    %cst_12 = arith.constant dense<0.000000e+00> : vector<8x32xf32>
    %11 = tpu.matmul %4, %10, %cst_12 {dimension_numbers = #tpu.dot_dimension_numbers<[1], [0], [0], [1], [0, 0, 1, 1], [], []>} : vector<8x32xf32>, vector<32x32xf32>, vector<8x32xf32> -> vector<8x32xf32>
    %c0_13 = arith.constant 0 : index
    %c0_14 = arith.constant 0 : index
    %12 = vector.load %arg5[%c0_13, %c0_14] : memref<1x32xf32, #tpu.memory_space<vmem>>, vector<1x32xf32>
    %13 = vector.broadcast %12 : vector<1x32xf32> to vector<8x32xf32>
    %14 = arith.addf %11, %13 : vector<8x32xf32>
    %c0_15 = arith.constant 0 : index
    %c0_16 = arith.constant 0 : index
    %15 = vector.load %arg6[%c0_15, %c0_16] : memref<32x32xf32, #tpu.memory_space<vmem>>, vector<32x32xf32>
    %cst_17 = arith.constant dense<0.000000e+00> : vector<8x32xf32>
    %16 = tpu.matmul %9, %15, %cst_17 {dimension_numbers = #tpu.dot_dimension_numbers<[1], [0], [0], [1], [0, 0, 1, 1], [], []>} : vector<8x32xf32>, vector<32x32xf32>, vector<8x32xf32> -> vector<8x32xf32>
    %c0_18 = arith.constant 0 : index
    %c0_19 = arith.constant 0 : index
    %17 = vector.load %arg7[%c0_18, %c0_19] : memref<1x32xf32, #tpu.memory_space<vmem>>, vector<1x32xf32>
    %18 = vector.broadcast %17 : vector<1x32xf32> to vector<8x32xf32>
    %19 = arith.addf %16, %18 : vector<8x32xf32>
    %c0_20 = arith.constant 0 : index
    %c0_21 = arith.constant 0 : index
    %20 = vector.load %arg8[%c0_20, %c0_21] : memref<32x8xf32, #tpu.memory_space<vmem>>, vector<32x8xf32>
    %cst_22 = arith.constant dense<0.000000e+00> : vector<8x8xf32>
    %21 = tpu.matmul %14, %20, %cst_22 {dimension_numbers = #tpu.dot_dimension_numbers<[1], [0], [0], [1], [0, 0, 1, 1], [], []>} : vector<8x32xf32>, vector<32x8xf32>, vector<8x8xf32> -> vector<8x8xf32>
    %c0_23 = arith.constant 0 : index
    %c0_24 = arith.constant 0 : index
    %22 = vector.load %arg9[%c0_23, %c0_24] : memref<32x8xf32, #tpu.memory_space<vmem>>, vector<32x8xf32>
    %cst_25 = arith.constant dense<0.000000e+00> : vector<8x8xf32>
    %23 = tpu.matmul %19, %22, %cst_25 {dimension_numbers = #tpu.dot_dimension_numbers<[1], [0], [0], [1], [0, 0, 1, 1], [], []>} : vector<8x32xf32>, vector<32x8xf32>, vector<8x8xf32> -> vector<8x8xf32>
    %24 = arith.addf %21, %23 : vector<8x8xf32>
    %c0_26 = arith.constant 0 : index
    %c0_27 = arith.constant 0 : index
    %25 = vector.load %arg10[%c0_26, %c0_27] : memref<1x8xf32, #tpu.memory_space<vmem>>, vector<1x8xf32>
    %26 = vector.broadcast %25 : vector<1x8xf32> to vector<8x8xf32>
    %27 = arith.addf %24, %26 : vector<8x8xf32>
    %c0_28 = arith.constant 0 : index
    %c0_29 = arith.constant 0 : index
    %28 = vector.load %arg11[%c0_28, %c0_29] : memref<8x8xf32, #tpu.memory_space<vmem>>, vector<8x8xf32>
    tpu.vector_store %arg11[%c0_28, %c0_29], %27 {strides = array<i32>} : memref<8x8xf32, #tpu.memory_space<vmem>>, vector<8x8xf32>,
    return
  }
}

module attributes {stable_mosaic.version = 11 : i64} {
  func.func @_branch_pool_kernel(%arg0: i32, %arg1: i32, %arg2: memref<1x128xi32, #tpu.memory_space<vmem>>, %arg3: memref<4x128x32xbf16, #tpu.memory_space<vmem>>, %arg4: memref<1x8x32xf32, #tpu.memory_space<vmem>>) attributes {dimension_semantics = [#tpu.dimension_semantics<parallel>, #tpu.dimension_semantics<arbitrary>], iteration_bounds = array<i64: 2, 1>, scalar_prefetch = 0 : i64, scratch_operands = 0 : i64, tpu.core_type = #tpu.core_type<tc>, window_params = [{transform_indices = @transform_0, window_bounds = array<i64: 1, 128>}, {transform_indices = @transform_1, window_bounds = array<i64: 4, 128, 32>}, {transform_indices = @transform_2, window_bounds = array<i64: 1, 8, 32>}]} {
    %c0_i32 = arith.constant 0 : i32
    %0 = arith.cmpi eq, %arg1, %c0_i32 : i32
    %1 = arith.extui %0 : i1 to i32
    %c0_i32_0 = arith.constant 0 : i32
    %2 = arith.cmpi ne, %1, %c0_i32_0 : i32
    scf.if %2 {
      %cst_12 = arith.constant 0.000000e+00 : f32
      %19 = vector.broadcast %cst_12 : f32 to vector<8x32xf32>
      %c0_13 = arith.constant 0 : index
      %c0_14 = arith.constant 0 : index
      %c0_15 = arith.constant 0 : index
      %20 = vector.load %arg4[%c0_13, %c0_14, %c0_15] : memref<1x8x32xf32, #tpu.memory_space<vmem>>, vector<1x8x32xf32>
      %21 = vector.shape_cast %20 : vector<1x8x32xf32> to vector<8x32xf32>
      %22 = vector.shape_cast %19 : vector<8x32xf32> to vector<1x8x32xf32>
      tpu.vector_store %arg4[%c0_13, %c0_14, %c0_15], %22 {strides = array<i32>} : memref<1x8x32xf32, #tpu.memory_space<vmem>>, vector<1x8x32xf32>,
    } else {
    }
    %c0 = arith.constant 0 : index
    %c0_1 = arith.constant 0 : index
    %c0_2 = arith.constant 0 : index
    %3 = vector.load %arg3[%c0, %c0_1, %c0_2] : memref<4x128x32xbf16, #tpu.memory_space<vmem>>, vector<4x128x32xbf16>
    %4 = arith.extf %3 : vector<4x128x32xbf16> to vector<4x128x32xf32>
    %cst = arith.constant dense<0.000000e+00> : vector<128x32xf32>
    %5 = vector.multi_reduction <add>, %4, %cst [0] : vector<4x128x32xf32> to vector<128x32xf32>
    %c0_3 = arith.constant 0 : index
    %c0_4 = arith.constant 0 : index
    %6 = vector.load %arg2[%c0_3, %c0_4] : memref<1x128xi32, #tpu.memory_space<vmem>>, vector<1x128xi32>
    %7 = tpu.iota {dimensions = array<i32: 0>} : vector<8x128xi32>
    %8 = vector.broadcast %6 : vector<1x128xi32> to vector<8x128xi32>
    %9 = arith.cmpi eq, %8, %7 : vector<8x128xi32>
    %10 = arith.extui %9 : vector<8x128xi1> to vector<8x128xi32>
    %11 = arith.sitofp %10 : vector<8x128xi32> to vector<8x128xf32>
    %c0_5 = arith.constant 0 : index
    %c0_6 = arith.constant 0 : index
    %c0_7 = arith.constant 0 : index
    %12 = vector.load %arg4[%c0_5, %c0_6, %c0_7] : memref<1x8x32xf32, #tpu.memory_space<vmem>>, vector<1x8x32xf32>
    %13 = vector.shape_cast %12 : vector<1x8x32xf32> to vector<8x32xf32>
    %cst_8 = arith.constant dense<0.000000e+00> : vector<8x32xf32>
    %14 = tpu.matmul %11, %5, %cst_8 {dimension_numbers = #tpu.dot_dimension_numbers<[1], [0], [0], [1], [0, 0, 1, 1], [], []>} : vector<8x128xf32>, vector<128x32xf32>, vector<8x32xf32> -> vector<8x32xf32>
    %15 = arith.addf %13, %14 : vector<8x32xf32>
    %c0_9 = arith.constant 0 : index
    %c0_10 = arith.constant 0 : index
    %c0_11 = arith.constant 0 : index
    %16 = vector.load %arg4[%c0_9, %c0_10, %c0_11] : memref<1x8x32xf32, #tpu.memory_space<vmem>>, vector<1x8x32xf32>
    %17 = vector.shape_cast %16 : vector<1x8x32xf32> to vector<8x32xf32>
    %18 = vector.shape_cast %15 : vector<8x32xf32> to vector<1x8x32xf32>
    tpu.vector_store %arg4[%c0_9, %c0_10, %c0_11], %18 {strides = array<i32>} : memref<1x8x32xf32, #tpu.memory_space<vmem>>, vector<1x8x32xf32>,
    return
  }
  func.func @transform_0(%arg0: i32, %arg1: i32) -> (i32, i32) {
    %c1_i32 = arith.constant 1 : i32
    %0 = arith.muli %arg0, %c1_i32 : i32
    %1 = arith.addi %0, %arg1 : i32
    %c0_i32 = arith.constant 0 : i32
    %c0_i32_0 = arith.constant 0 : i32
    return %c0_i32, %1 : i32, i32
  }
  func.func @transform_1(%arg0: i32, %arg1: i32) -> (i32, i32, i32) {
    %c1_i32 = arith.constant 1 : i32
    %0 = arith.muli %arg0, %c1_i32 : i32
    %1 = arith.addi %0, %arg1 : i32
    %c0_i32 = arith.constant 0 : i32
    %c0_i32_0 = arith.constant 0 : i32
    %c0_i32_1 = arith.constant 0 : i32
    return %c0_i32, %1, %c0_i32_0 : i32, i32, i32
  }
  func.func @transform_2(%arg0: i32, %arg1: i32) -> (i32, i32, i32) {
    %c0_i32 = arith.constant 0 : i32
    %c0_i32_0 = arith.constant 0 : i32
    %c0_i32_1 = arith.constant 0 : i32
    return %arg0, %c0_i32, %c0_i32_0 : i32, i32, i32
  }
}

</mosaic_0001>

<bundles_post_ra>
// kernel: predictor_forward.5
= control target key start
LH: loop header
LB: loop body
LE: loop exit
PB: predicated region body
PF: predicated region fallthrough
CT: control target
= control target key end

     0   :  { %v499_v0 = vmov 0   ;;  %v500_v2 = vmov 0.0|0.0   ;;  %vm501_vm0 = vmmov 0   ;;  %v502_v11 = vmov 0.0   ;;  %s661_s2 = inlined_call_operand.vmem [shape: f32[8,1], index: 2, kind: input, shape index: {}]   ;;  %s662_s3 = inlined_call_operand.vmem [shape: f32[8,1], index: 3, kind: input, shape index: {}]   ;;  %s663_s4 = inlined_call_operand.vmem [shape: f32[32,32], index: 4, kind: input, shape index: {}]   ;;  %s664_s6 = inlined_call_operand.vmem [shape: f32[32,32], index: 6, kind: input, shape index: {}]   ;;  %s665_s0 = inlined_call_operand.vmem [shape: f32[2,8,32], index: 0, kind: input, shape index: {}]   ;;  %s666_s1 = inlined_call_operand.vmem [shape: f32[2,8,32], index: 1, kind: input, shape index: {}]   ;;  %s667_s8 = inlined_call_operand.vmem [shape: f32[32,8], index: 8, kind: input, shape index: {}]   ;;  %s668_s9 = inlined_call_operand.vmem [shape: f32[32,8], index: 9, kind: input, shape index: {}]   ;;  %s669_s5 = inlined_call_operand.vmem [shape: f32[1,32], index: 5, kind: input, shape index: {}]   ;;  %s670_s7 = inlined_call_operand.vmem [shape: f32[1,32], index: 7, kind: input, shape index: {}]   ;;  %s671_s10 = inlined_call_operand.vmem [shape: f32[1,8], index: 10, kind: input, shape index: {}]   ;;  %s672_s11 = inlined_call_operand.vmem [shape: f32[8,8], index: 11, kind: output, shape index: {}]  }
   0x1   :  { %498 = vset.pattern.permute.xlu0 %v499_v0  ;;  %v44_v1 = vld [vmem:[%s661_s2] sm:$0xff]  ;;  %470 = vmatprep.subr.bf16.mxu0 %v500_v2  ;;  %v64_v4 = vld [vmem:[%s663_s4 + $0x8] sm:$0xff]  ;;  %v65_v5 = vld [vmem:[%s663_s4 + $0x10] sm:$0xff]  ;;  %vm40_vm1 = vcmask 261120   ;;  %vm393_vm2 = vcmask 64512  }
   0x2   :  { %v63_v3 = vld [vmem:[%s663_s4] sm:$0xff]  ;;  %47 = vperm.xlu0 %498, %v44_v1   ;;  %476 = vmatprep.subr.bf16.mxu1 %v500_v2  ;;  %v66_v6 = vld [vmem:[%s663_s4 + $0x18] sm:$0xff]  ;;  %v148_v10 = vld [vmem:[%s664_s6 + $0x8] sm:$0xff] }
   0x3   :  { %v56_v7 = vld [vmem:[%s662_s3] sm:$0xff]  ;;  %v471_v8 = vpack.c.bf16 %v64_v4, %v63_v3  ;;  %434 = vmatprep.mubr.msk.f32.mxu0 %vm501_vm0, %v502_v11  ;;  %445 = vmatprep.mubr.msk.f32.mxu1 %vm501_vm0, %v502_v11  ;;  %v149_v13 = vld [vmem:[%s664_s6 + $0x10] sm:$0xff]  ;;  %v150_v14 = vld [vmem:[%s664_s6 + $0x18] sm:$0xff]  ;;  %v474_v15 = vpack.c.bf16 %v66_v6, %v65_v5 }
   0x4   :  { %v147_v9 = vld [vmem:[%s664_s6] sm:$0xff]  ;;  %v480_v16 = vpack.c.bf16 %v150_v14, %v149_v13  ;;  %v39_v18 = vld [vmem:[%s665_s0 + $0x8] sm:$0xff]  ;;  %v233_v36 = vld [vmem:[%s667_s8 + $0x10] sm:$0xff] }
   0x5   :  { %v477_v12 = vpack.c.bf16 %v148_v10, %v147_v9  ;;  %472 = vmatpush3.bf16.msra.mxu0 %v471_v8  ;;  %v38_v17 = vld [vmem:[%s665_s0] sm:$0xff]  ;;  %v42_v20 = vsel %vm40_vm1, %v39_v18, 0.0  ;;  %v52_v22 = vld [vmem:[%s666_s1 + $0x8] sm:$0xff]  ;;  %v234_v38 = vld [vmem:[%s667_s8 + $0x18] sm:$0xff] }
   0x6   :  { %59 = vperm.xlu0 %498, %v56_v7   ;;  %473 = vmatprep.subr.bf16.mxu0 %v500_v2  ;;  %v41_v19 = vsel %vm40_vm1, %v38_v17, 0.0  ;;  %v51_v21 = vld [vmem:[%s666_s1] sm:$0xff]  ;;  %v54_v25 = vsel %vm40_vm1, %v52_v22, 0.0  ;;  %v232_v30 = vld [vmem:[%s667_s8 + $0x8] sm:$0xff]  ;;  %v492_v39 = vpack.c.bf16 %v234_v38, %v233_v36  ;;  %v237_v40 = vld [vmem:[%s668_s9 + $0x10] sm:$0xff] }
   0x7   :  { %478 = vmatpush3.bf16.msra.mxu1 %v477_v12  ;;  %v43_v23 = vadd.f32 %v42_v20, %v41_v19  ;;  %v53_v24 = vsel %vm40_vm1, %v51_v21, 0.0  ;;  %v231_v29 = vld [vmem:[%s667_s8] sm:$0xff]  ;;  %v236_v35 = vld [vmem:[%s668_s9 + $0x8] sm:$0xff]  ;;  %v238_v41 = vld [vmem:[%s668_s9 + $0x18] sm:$0xff] }
   0x8   :  { %479 = vmatprep.subr.bf16.mxu1 %v500_v2  ;;  %v55_v28 = vadd.f32 %v54_v25, %v53_v24  ;;  %v489_v32 = vpack.c.bf16 %v232_v30, %v231_v29  ;;  %v235_v34 = vld [vmem:[%s668_s9] sm:$0xff]  ;;  %v486_v42 = vpack.c.bf16 %v238_v41, %v237_v40 }
   0x9   :  { %475 = vmatpush3.bf16.msra.mxu0 %v474_v15  ;;  %v483_v37 = vpack.c.bf16 %v236_v35, %v235_v34  ;;  %v399_v43 = vld [vmem:[%s669_s5] ss:$0 sm:$0xff] }
   0xa   :  { %482 = vmatprep.subr.bf16.mxu0 %v500_v2  ;;  %v401_v47 = vld [vmem:[%s670_s7] ss:$0 sm:$0xff] }
   0xb   :  { %481 = vmatpush3.bf16.msra.mxu1 %v480_v16  ;;  %v405_v54 = vld [vmem:[%s671_s10] ss:$0 sm:$0xff] }
   0xc   :  { %488 = vmatprep.subr.bf16.mxu1 %v500_v2 }
  0x81   :  { %v48_v26 = vpop.permute.xlu0 %47 }
  0x82   :  { %v50_v27 = vmul.f32 %v48_v26, %v43_v23 }
  0x84   :  { %435 = vmatmul.mubr.msk.f32.vlgmr.msra.gmra.mrb[0].mxu0 %vm40_vm1, %v50_v27 }
  0x85   :  { %v60_v31 = vpop.permute.xlu0 %59  ;;  %456 = vmatprep.mubr.msk.f32.mxu0 %vm501_vm0, %v502_v11  ;;  %484 = vmatpush3.bf16.msra.mxu0 %v483_v37 }
  0x86   :  { %v62_v33 = vmul.f32 %v60_v31, %v55_v28  ;;  %485 = vmatprep.subr.bf16.mxu0 %v500_v2 }
  0x88   :  { %446 = vmatmul.mubr.msk.f32.vlgmr.msra.gmra.mrb[0].mxu1 %vm40_vm1, %v62_v33 }
  0x89   :  { %490 = vmatpush3.bf16.msra.mxu1 %v489_v32  ;;  %467 = vmatprep.mubr.msk.f32.mxu1 %vm501_vm0, %v502_v11 }
  0x8a   :  { %491 = vmatprep.subr.bf16.mxu1 %v500_v2  ;;  %487 = vmatpush3.bf16.msra.mxu0 %v486_v42 }
  0x8d   :  { %493 = vmatpush3.bf16.msra.mxu1 %v492_v39 }
 0x157   :  { %v143_v44 = vpop.f32.mrb[0].mxu0 }
 0x158   :  { %v144_v45 = vadd.f32 %v399_v43, %v143_v44  ;;  %v436_v46 = vpop.f32.mrb[1].mxu0 }
 0x15a   :  { %468 = vmatmul.mubr.msk.f32.vlgmr.msra.gmra.mrb[2].mxu1 %vm40_vm1, %v144_v45 }
 0x15b   :  { %v227_v48 = vpop.f32.mrb[0].mxu1 }
 0x15c   :  { %v228_v49 = vadd.f32 %v401_v47, %v227_v48  ;;  %v447_v50 = vpop.f32.mrb[1].mxu1 }
 0x15e   :  { %457 = vmatmul.mubr.msk.f32.vlgmr.msra.gmra.mrb[2].mxu0 %vm40_vm1, %v228_v49 }
 0x22d   :  { %v381_v51 = vpop.f32.mrb[2].mxu1 }
 0x22e   :  { %v469_v52 = vpop.f32.mrb[3].mxu1 }
 0x231   :  { %v308_v53 = vpop.f32.mrb[2].mxu0 }
 0x232   :  { %v382_v55 = vadd.f32 %v381_v51, %v308_v53  ;;  %v458_v56 = vpop.f32.mrb[3].mxu0 }
 0x234   :  { %v392_v57 = vadd.f32 %v405_v54, %v382_v55 }
 0x236   :  { %394 = vst.msk [vmem:[%s672_s11] sm:$0xff] %vm393_vm2, %v392_v57 }

// kernel: predictor_forward.3
= control target key start
LH: loop header
LB: loop body
LE: loop exit
PB: predicated region body
PF: predicated region fallthrough
CT: control target
= control target key end

     0   :  { %s1235_s9 = smov 0   ;;  %s1237_s10 = smov 0   ;;  %s1489_s0 = inlined_call_operand.vmem [shape: s32[1,256], index: 0, kind: input, shape index: {}]   ;;  %s1490_s1 = inlined_call_operand.vmem [shape: bf16[4,256,32], index: 1, kind: input, shape index: {}]   ;;  %s1491_s2 = inlined_call_operand.vmem [shape: f32[2,8,32], index: 2, kind: output, shape index: {}]  }
   0x1   :  { %s1239_s11 = smov 0   ;;  %s1241_s12 = smov 0  }
   0x2   :  { %s1243_s13 = smov 0  }
   0x3 LB: > { %s24_s14 = sadd.s32 1, %s1210_s12  ;;  %p68_p1 = scmp.ne.s32.totalorder %s1202_s10, %s1198_s9  ;;  %s1214_s13 = sphi %s1243_s13, %s12_s13   ;;  %s1210_s12 = sphi %s1241_s12, %s1495_s12   ;;  %s1206_s11 = sphi %s1239_s11, %s1494_s11   ;;  %s1202_s10 = sphi %s1237_s10, %s1493_s10   ;;  %s1198_s9 = sphi %s1235_s9, %s1492_s9  }
   0x4   : > { %p26_p0 = scmp.ge.s32.totalorder %s24_s14, 2  ;;  %p69_p2 = scmp.eq.s32.totalorder %s1214_s13, 0 }
   0x5   : > { %s61_s16 = sadd.s32 1, %s1202_s10  ;;  %p884_p5 = scmp.ge.s32.totalorder %s1214_s13, 2 }
   0x6   : > { %s1497_s14 = smov (%p26_p0, %s24_s14), 0  ;;  %p70_p3 = por %p69_p2, %p68_p1 }
   0x7   : > { %s58_s15 = ssub.s32 %s1210_s12, %s1497_s14  ;;  %120 = sbr.rel (%p884_p5) target bundleno = 34 (0x22), region = 16 }
   0x8   : > { %p59_p4 = scmp.eq.s32.totalorder %s58_s15, 0 }
   0xa   : > { %s1270_s17 = scalar_select %p59_p4, %s1202_s10, %s61_s16  }
   0xe   : > { %131 = sbr.rel (!%p70_p3) target bundleno = 34 (0x22), region = 24  ;;  %s133_s18 = sand.u32 (%p70_p3), 1, %s1202_s10  }
   0xf   : > { %s896_s19 = sshll.u32 (%p70_p3), %s1210_s12, 6  ;;  %s885_s20 = sshll.u32 (%p70_p3), %s133_s18, 8 }
  0x10   : > { %s1278_s23 = scalar_lea.vmem (%p70_p3), %s1490_s1, %s896_s19  ;;  %s1283_s24 = scalar_lea.vmem (%p70_p3), [#allocation2], %s885_s20 }
  0x11   : > { %v155_v0 = vld [vmem:[%s1278_s23] sm:$0xff] (%p70_p3)   ;;  %v159_v1 = vld [vmem:[%s1278_s23 + $0x8] sm:$0xff] (%p70_p3)   ;;  %v163_v2 = vld [vmem:[%s1278_s23 + $0x10] sm:$0xff] (%p70_p3)  }
  0x12   : > { %156 = vst [vmem:[%s1283_s24] sm:$0xff] (%p70_p3), %v155_v0   ;;  %160 = vst [vmem:[%s1283_s24 + $0x8] sm:$0xff] (%p70_p3), %v159_v1   ;;  %v167_v3 = vld [vmem:[%s1278_s23 + $0x18] sm:$0xff] (%p70_p3)   ;;  %v171_v4 = vld [vmem:[%s1278_s23 + $0x20] sm:$0xff] (%p70_p3)  }
  0x13   : > { %164 = vst [vmem:[%s1283_s24 + $0x10] sm:$0xff] (%p70_p3), %v163_v2   ;;  %v175_v5 = vld [vmem:[%s1278_s23 + $0x28] sm:$0xff] (%p70_p3)   ;;  %168 = vst [vmem:[%s1283_s24 + $0x18] sm:$0xff] (%p70_p3), %v167_v3   ;;  %v179_v6 = vld [vmem:[%s1278_s23 + $0x30] sm:$0xff] (%p70_p3)  }
  0x14   : > { %172 = vst [vmem:[%s1283_s24 + $0x20] sm:$0xff] (%p70_p3), %v171_v4   ;;  %176 = vst [vmem:[%s1283_s24 + $0x28] sm:$0xff] (%p70_p3), %v175_v5   ;;  %v183_v7 = vld [vmem:[%s1278_s23 + $0x38] sm:$0xff] (%p70_p3)   ;;  %v187_v8 = vld [vmem:[%s1278_s23 + $0x80] sm:$0xff] (%p70_p3)  }
  0x15   : > { %180 = vst [vmem:[%s1283_s24 + $0x30] sm:$0xff] %v179_v6   ;;  %184 = vst [vmem:[%s1283_s24 + $0x38] sm:$0xff] %v183_v7   ;;  %v191_v9 = vld [vmem:[%s1278_s23 + $0x88] sm:$0xff]   ;;  %v195_v10 = vld [vmem:[%s1278_s23 + $0x90] sm:$0xff]  }
  0x16   : > { %188 = vst [vmem:[%s1283_s24 + $0x40] sm:$0xff] %v187_v8   ;;  %v199_v11 = vld [vmem:[%s1278_s23 + $0x98] sm:$0xff]   ;;  %192 = vst [vmem:[%s1283_s24 + $0x48] sm:$0xff] %v191_v9   ;;  %v203_v12 = vld [vmem:[%s1278_s23 + $0xa0] sm:$0xff]  }
  0x17   : > { %196 = vst [vmem:[%s1283_s24 + $0x50] sm:$0xff] %v195_v10   ;;  %200 = vst [vmem:[%s1283_s24 + $0x58] sm:$0xff] %v199_v11   ;;  %v207_v13 = vld [vmem:[%s1278_s23 + $0xa8] sm:$0xff]   ;;  %v211_v14 = vld [vmem:[%s1278_s23 + $0xb0] sm:$0xff]  }
  0x18   : > { %204 = vst [vmem:[%s1283_s24 + $0x60] sm:$0xff] %v203_v12   ;;  %208 = vst [vmem:[%s1283_s24 + $0x68] sm:$0xff] %v207_v13   ;;  %v215_v15 = vld [vmem:[%s1278_s23 + $0xb8] sm:$0xff]   ;;  %v219_v16 = vld [vmem:[%s1278_s23 + $0x100] sm:$0xff]  }
  0x19   : > { %212 = vst [vmem:[%s1283_s24 + $0x70] sm:$0xff] %v211_v14   ;;  %v223_v17 = vld [vmem:[%s1278_s23 + $0x108] sm:$0xff]   ;;  %216 = vst [vmem:[%s1283_s24 + $0x78] sm:$0xff] %v215_v15   ;;  %v227_v18 = vld [vmem:[%s1278_s23 + $0x110] sm:$0xff]  }
  0x1a   : > { %220 = vst [vmem:[%s1283_s24 + $0x80] sm:$0xff] %v219_v16   ;;  %224 = vst [vmem:[%s1283_s24 + $0x88] sm:$0xff] %v223_v17   ;;  %v231_v19 = vld [vmem:[%s1278_s23 + $0x118] sm:$0xff]   ;;  %v235_v20 = vld [vmem:[%s1278_s23 + $0x120] sm:$0xff]  }
  0x1b   : > { %228 = vst [vmem:[%s1283_s24 + $0x90] sm:$0xff] %v227_v18   ;;  %232 = vst [vmem:[%s1283_s24 + $0x98] sm:$0xff] %v231_v19   ;;  %v239_v21 = vld [vmem:[%s1278_s23 + $0x128] sm:$0xff]   ;;  %v243_v22 = vld [vmem:[%s1278_s23 + $0x130] sm:$0xff]  }
  0x1c   : > { %236 = vst [vmem:[%s1283_s24 + $0xa0] sm:$0xff] %v235_v20   ;;  %v247_v23 = vld [vmem:[%s1278_s23 + $0x138] sm:$0xff]   ;;  %240 = vst [vmem:[%s1283_s24 + $0xa8] sm:$0xff] %v239_v21   ;;  %v251_v24 = vld [vmem:[%s1278_s23 + $0x180] sm:$0xff]  }
  0x1d   : > { %244 = vst [vmem:[%s1283_s24 + $0xb0] sm:$0xff] %v243_v22   ;;  %248 = vst [vmem:[%s1283_s24 + $0xb8] sm:$0xff] %v247_v23   ;;  %v255_v25 = vld [vmem:[%s1278_s23 + $0x188] sm:$0xff]   ;;  %v259_v26 = vld [vmem:[%s1278_s23 + $0x190] sm:$0xff]  }
  0x1e   : > { %252 = vst [vmem:[%s1283_s24 + $0xc0] sm:$0xff] %v251_v24   ;;  %256 = vst [vmem:[%s1283_s24 + $0xc8] sm:$0xff] %v255_v25   ;;  %v263_v27 = vld [vmem:[%s1278_s23 + $0x198] sm:$0xff]   ;;  %v267_v28 = vld [vmem:[%s1278_s23 + $0x1a0] sm:$0xff]  }
  0x1f   : > { %260 = vst [vmem:[%s1283_s24 + $0xd0] sm:$0xff] %v259_v26   ;;  %v271_v29 = vld [vmem:[%s1278_s23 + $0x1a8] sm:$0xff]   ;;  %264 = vst [vmem:[%s1283_s24 + $0xd8] sm:$0xff] %v263_v27   ;;  %v275_v30 = vld [vmem:[%s1278_s23 + $0x1b0] sm:$0xff]  }
  0x20   : > { %268 = vst [vmem:[%s1283_s24 + $0xe0] sm:$0xff] %v267_v28   ;;  %272 = vst [vmem:[%s1283_s24 + $0xe8] sm:$0xff] %v271_v29   ;;  %v279_v31 = vld [vmem:[%s1278_s23 + $0x1b8] sm:$0xff]  }
  0x21   : > { %276 = vst [vmem:[%s1283_s24 + $0xf0] sm:$0xff] %v275_v30   ;;  %280 = vst [vmem:[%s1283_s24 + $0xf8] sm:$0xff] %v279_v31  }
  0x22 PF: > { %p888_p6 = scmp.ge.s32.totalorder %s1214_s13, 1  ;;  %p432_p7 = scmp.lt.s32.totalorder %s1214_s13, 3 }
  0x24   : > { %p433_p8 = pnand %p888_p6, %p432_p7 }
  0x25   : > { %s439_s25 = sand.u32 (!%p433_p8), 1, %s1198_s9   ;;  %p464_p9 = scmp.lt.s32.totalorder (!%p433_p8), %s1206_s11, 1  ;;  %v1216_v32 = vmov (!%p433_p8), 0.0|0.0   ;;  %vm1217_vm0 = vmmov (!%p433_p8), 0   ;;  %v1218_v33 = vmov (!%p433_p8), 0.0   ;;  %vm478_vm1 = vcmask (!%p433_p8), 261120  }
  0x26   : > { %436 = sbr.rel (%p433_p8) target bundleno = 311 (0x137), region = 65  ;;  %1108 = vmatprep.subr.bf16.mxu0 (!%p433_p8), %v1216_v32  ;;  %s889_s26 = sshll.u32 (!%p433_p8), %s439_s25, 8  ;;  %1105 = vmatprep.mubr.msk.f32.mxu0 (!%p433_p8), %vm1217_vm0, %v1218_v33 }
  0x27   : > { %s1351_s27 = scalar_lea.vmem (!%p433_p8), [#allocation2], %s889_s26 }
  0x28   : > { %v898_v34 = vld [vmem:[%s1351_s27] sm:$0xff] (!%p433_p8)   ;;  %v1025_v46 = vld [vmem:[%s1351_s27 + $0x8] sm:$0xff] (!%p433_p8)   ;;  %v1026_v10 = vld [vmem:[%s1351_s27 + $0x10] sm:$0xff] (!%p433_p8)  }
  0x29   : > { %v1032_v35 = vld [vmem:[%s1351_s27 + $0x40] sm:$0xff] (!%p433_p8)   ;;  %v899_v37 = vunpack.c.l.bf16 (!%p433_p8), %v898_v34  ;;  %v900_v38 = vunpack.c.h.bf16 (!%p433_p8), %v898_v34  ;;  %v1033_v51 = vld [vmem:[%s1351_s27 + $0x48] sm:$0xff] (!%p433_p8)   ;;  %v903_v60 = vunpack.c.l.bf16 (!%p433_p8), %v1025_v46  ;;  %v904_v61 = vunpack.c.h.bf16 (!%p433_p8), %v1025_v46  ;;  %v1034_v15 = vld [vmem:[%s1351_s27 + $0x50] sm:$0xff] (!%p433_p8)  }
  0x2a   : > { %v1040_v36 = vld [vmem:[%s1351_s27 + $0x80] sm:$0xff] (!%p433_p8)   ;;  %v931_v39 = vunpack.c.l.bf16 (!%p433_p8), %v1032_v35  ;;  %v932_v40 = vunpack.c.h.bf16 (!%p433_p8), %v1032_v35  ;;  %v1041_v56 = vld [vmem:[%s1351_s27 + $0x88] sm:$0xff] (!%p433_p8)   ;;  %v935_v0 = vunpack.c.l.bf16 (!%p433_p8), %v1033_v51  ;;  %v936_v1 = vunpack.c.h.bf16 (!%p433_p8), %v1033_v51  ;;  %v1042_v16 = vld [vmem:[%s1351_s27 + $0x90] sm:$0xff] (!%p433_p8)  }
  0x2b   : > { %v1048_v41 = vld [vmem:[%s1351_s27 + $0xc0] sm:$0xff] (!%p433_p8)   ;;  %v963_v42 = vunpack.c.l.bf16 (!%p433_p8), %v1040_v36  ;;  %v964_v43 = vunpack.c.h.bf16 (!%p433_p8), %v1040_v36  ;;  %v609_v47 = vsel (!%p433_p8), %vm478_vm1, %v899_v37, 0.0  ;;  %v616_v49 = vsel (!%p433_p8), %vm478_vm1, %v900_v38, 0.0  ;;  %v1049_v57 = vld [vmem:[%s1351_s27 + $0xc8] sm:$0xff] (!%p433_p8)   ;;  %v1050_v21 = vld [vmem:[%s1351_s27 + $0xd0] sm:$0xff] (!%p433_p8)  }
  0x2c   : > { %v995_v44 = vunpack.c.l.bf16 (!%p433_p8), %v1048_v41  ;;  %v996_v45 = vunpack.c.h.bf16 (!%p433_p8), %v1048_v41  ;;  %v610_v48 = vsel (!%p433_p8), %vm478_vm1, %v931_v39, 0.0  ;;  %v617_v50 = vsel (!%p433_p8), %vm478_vm1, %v932_v40, 0.0  ;;  %v1027_v35 = vld [vmem:[%s1351_s27 + $0x18] sm:$0xff] (!%p433_p8)  }
  0x2d   : > { %s1499_s11 = smov (!%p464_p9, %s1206_s11), 1  ;;  %v611_v52 = vadd.f32 %v610_v48, %v609_v47  ;;  %v612_v53 = vsel %vm478_vm1, %v963_v42, 0.0  ;;  %v618_v55 = vadd.f32 %v617_v50, %v616_v49  ;;  %v619_v58 = vsel %vm478_vm1, %v964_v43, 0.0  ;;  %v1035_v40 = vld [vmem:[%s1351_s27 + $0x58] sm:$0xff]  }
  0x2e   : > { %s890_s28 = sshll.u32 %s1499_s11, 3  ;;  %v614_v54 = vsel %vm478_vm1, %v995_v44, 0.0  ;;  %v621_v59 = vsel %vm478_vm1, %v996_v45, 0.0  ;;  %v967_v2 = vunpack.c.l.bf16 %v1041_v56  ;;  %v968_v3 = vunpack.c.h.bf16 %v1041_v56  ;;  %v1043_v45 = vld [vmem:[%s1351_s27 + $0x98] sm:$0xff]   ;;  %s466_s6 = scalar_lea.vmem %s1489_s0, %s1499_s11 }
  0x2f   : > { %s1370_s3 = scalar_lea.vmem %s1491_s2, %s890_s28  ;;  %v613_v62 = vadd.f32 %v612_v53, %v611_v52  ;;  %v620_v63 = vadd.f32 %v619_v58, %v618_v55  ;;  %v999_v4 = vunpack.c.l.bf16 %v1049_v57  ;;  %v1000_v5 = vunpack.c.h.bf16 %v1049_v57  ;;  %v1051_v50 = vld [vmem:[%s1351_s27 + $0xd8] sm:$0xff]  }
  0x30   : > { %479 = vst.msk [vmem:[%s1370_s3] sm:$0xff] %vm478_vm1, %v1218_v33  ;;  %v623_v8 = vsel %vm478_vm1, %v903_v60, 0.0  ;;  %v624_v9 = vsel %vm478_vm1, %v935_v0, 0.0  ;;  %v626_v12 = vsel %vm478_vm1, %v967_v2, 0.0  ;;  %v630_v14 = vsel %vm478_vm1, %v904_v61, 0.0 }
  0x31   : > { %v615_v6 = vadd.f32 %v614_v54, %v613_v62  ;;  %v622_v7 = vadd.f32 %v621_v59, %v620_v63  ;;  %v625_v11 = vadd.f32 %v624_v9, %v623_v8  ;;  %v628_v13 = vsel %vm478_vm1, %v999_v4, 0.0  ;;  %v1028_v63 = vld [vmem:[%s1351_s27 + $0x20] sm:$0xff]  }
  0x32   : > { %v631_v18 = vsel %vm478_vm1, %v936_v1, 0.0  ;;  %v633_v19 = vsel %vm478_vm1, %v968_v3, 0.0  ;;  %v635_v20 = vsel %vm478_vm1, %v1000_v5, 0.0  ;;  %v907_v24 = vunpack.c.l.bf16 %v1026_v10  ;;  %v1036_v4 = vld [vmem:[%s1351_s27 + $0x60] sm:$0xff]  }
  0x33   : > { %v1109_v17 = vpack.c.bf16 %v622_v7, %v615_v6  ;;  %v627_v22 = vadd.f32 %v626_v12, %v625_v11  ;;  %v632_v23 = vadd.f32 %v631_v18, %v630_v14  ;;  %v908_v25 = vunpack.c.h.bf16 %v1026_v10  ;;  %v1044_v9 = vld [vmem:[%s1351_s27 + $0xa0] sm:$0xff]  }
  0x34   : > { %v939_v26 = vunpack.c.l.bf16 %v1034_v15  ;;  %v940_v27 = vunpack.c.h.bf16 %v1034_v15  ;;  %v971_v28 = vunpack.c.l.bf16 %v1042_v16  ;;  %v972_v29 = vunpack.c.h.bf16 %v1042_v16  ;;  %v1052_v10 = vld [vmem:[%s1351_s27 + $0xe0] sm:$0xff]  }
  0x35   : > { %1110 = vmatpush3.bf16.msra.mxu0 %v1109_v17  ;;  %v629_v30 = vadd.f32 %v628_v13, %v627_v22  ;;  %v634_v31 = vadd.f32 %v633_v19, %v632_v23  ;;  %v1003_v33 = vunpack.c.l.bf16 %v1050_v21  ;;  %v1004_v34 = vunpack.c.h.bf16 %v1050_v21 }
  0x36   : > { %1111 = vmatprep.subr.bf16.mxu0 %v1216_v32  ;;  %v637_v36 = vsel %vm478_vm1, %v907_v24, 0.0  ;;  %v638_v37 = vsel %vm478_vm1, %v939_v26, 0.0  ;;  %v640_v38 = vsel %vm478_vm1, %v971_v28, 0.0  ;;  %v644_v39 = vsel %vm478_vm1, %v908_v25, 0.0 }
  0x37   : > { %v636_v41 = vadd.f32 %v635_v20, %v634_v31  ;;  %v639_v42 = vadd.f32 %v638_v37, %v637_v36  ;;  %v642_v43 = vsel %vm478_vm1, %v1003_v33, 0.0  ;;  %v645_v44 = vsel %vm478_vm1, %v940_v27, 0.0  ;;  %v1029_v27 = vld [vmem:[%s1351_s27 + $0x28] sm:$0xff]  }
  0x38   : > { %v646_v46 = vadd.f32 %v645_v44, %v644_v39  ;;  %v647_v47 = vsel %vm478_vm1, %v972_v29, 0.0  ;;  %v649_v48 = vsel %vm478_vm1, %v1004_v34, 0.0  ;;  %v911_v49 = vunpack.c.l.bf16 %v1027_v35  ;;  %v1037_v33 = vld [vmem:[%s1351_s27 + $0x68] sm:$0xff]  }
  0x39   : > { %v1112_v51 = vpack.c.bf16 %v636_v41, %v629_v30  ;;  %v641_v52 = vadd.f32 %v640_v38, %v639_v42  ;;  %v912_v53 = vunpack.c.h.bf16 %v1027_v35  ;;  %v943_v54 = vunpack.c.l.bf16 %v1035_v40  ;;  %v1045_v34 = vld [vmem:[%s1351_s27 + $0xa8] sm:$0xff]  }
  0x3a   : > { %v648_v55 = vadd.f32 %v647_v47, %v646_v46  ;;  %v944_v56 = vunpack.c.h.bf16 %v1035_v40  ;;  %v975_v57 = vunpack.c.l.bf16 %v1043_v45  ;;  %v976_v58 = vunpack.c.h.bf16 %v1043_v45  ;;  %v1053_v39 = vld [vmem:[%s1351_s27 + $0xe8] sm:$0xff]  }
  0x3b   : > { %1113 = vmatpush3.bf16.msra.mxu0 %v1112_v51  ;;  %v643_v59 = vadd.f32 %v642_v43, %v641_v52  ;;  %v1007_v60 = vunpack.c.l.bf16 %v1051_v50  ;;  %v1008_v61 = vunpack.c.h.bf16 %v1051_v50  ;;  %v651_v62 = vsel %vm478_vm1, %v911_v49, 0.0  ;;  %v1030_v52 = vld [vmem:[%s1351_s27 + $0x30] sm:$0xff]  }
  0x3c   : > { %1114 = vmatprep.subr.bf16.mxu0 %v1216_v32  ;;  %v650_v0 = vadd.f32 %v649_v48, %v648_v55  ;;  %v652_v1 = vsel %vm478_vm1, %v943_v54, 0.0  ;;  %v654_v2 = vsel %vm478_vm1, %v975_v57, 0.0  ;;  %v658_v3 = vsel %vm478_vm1, %v912_v53, 0.0 }
  0x3d   : > { %v653_v5 = vadd.f32 %v652_v1, %v651_v62  ;;  %v656_v6 = vsel %vm478_vm1, %v1007_v60, 0.0  ;;  %v659_v7 = vsel %vm478_vm1, %v944_v56, 0.0  ;;  %v661_v8 = vsel %vm478_vm1, %v976_v58, 0.0  ;;  %v1046_v62 = vld [vmem:[%s1351_s27 + $0xb0] sm:$0xff]  }
  0x3e   : > { %v1115_v11 = vpack.c.bf16 %v650_v0, %v643_v59  ;;  %v660_v12 = vadd.f32 %v659_v7, %v658_v3  ;;  %v663_v13 = vsel %vm478_vm1, %v1008_v61, 0.0  ;;  %v915_v14 = vunpack.c.l.bf16 %v1028_v63  ;;  %v1038_v61 = vld [vmem:[%s1351_s27 + $0x70] sm:$0xff]  }
  0x3f   : > { %v655_v15 = vadd.f32 %v654_v2, %v653_v5  ;;  %v916_v16 = vunpack.c.h.bf16 %v1028_v63  ;;  %v947_v17 = vunpack.c.l.bf16 %v1036_v4  ;;  %v948_v18 = vunpack.c.h.bf16 %v1036_v4  ;;  %v1054_v3 = vld [vmem:[%s1351_s27 + $0xf0] sm:$0xff]  }
  0x40   : > { %1116 = vmatpush3.bf16.msra.mxu0 %v1115_v11  ;;  %v662_v19 = vadd.f32 %v661_v8, %v660_v12  ;;  %v979_v20 = vunpack.c.l.bf16 %v1044_v9  ;;  %v980_v21 = vunpack.c.h.bf16 %v1044_v9  ;;  %v1011_v22 = vunpack.c.l.bf16 %v1052_v10 }
  0x41   : > { %1117 = vmatprep.subr.bf16.mxu0 %v1216_v32  ;;  %v657_v23 = vadd.f32 %v656_v6, %v655_v15  ;;  %v1012_v24 = vunpack.c.h.bf16 %v1052_v10  ;;  %v665_v25 = vsel %vm478_vm1, %v915_v14, 0.0  ;;  %v666_v26 = vsel %vm478_vm1, %v947_v17, 0.0 }
  0x42   : > { %v664_v28 = vadd.f32 %v663_v13, %v662_v19  ;;  %v667_v29 = vadd.f32 %v666_v26, %v665_v25  ;;  %v668_v30 = vsel %vm478_vm1, %v979_v20, 0.0  ;;  %v670_v31 = vsel %vm478_vm1, %v1011_v22, 0.0  ;;  %v1047_v26 = vld [vmem:[%s1351_s27 + $0xb8] sm:$0xff]  }
  0x43   : > { %v672_v35 = vsel %vm478_vm1, %v916_v16, 0.0  ;;  %v673_v36 = vsel %vm478_vm1, %v948_v18, 0.0  ;;  %v675_v37 = vsel %vm478_vm1, %v980_v21, 0.0  ;;  %v677_v38 = vsel %vm478_vm1, %v1012_v24, 0.0  ;;  %v1031_v16 = vld [vmem:[%s1351_s27 + $0x38] sm:$0xff]  }
  0x44   : > { %v1118_v40 = vpack.c.bf16 %v664_v28, %v657_v23  ;;  %v669_v41 = vadd.f32 %v668_v30, %v667_v29  ;;  %v674_v42 = vadd.f32 %v673_v36, %v672_v35  ;;  %v919_v43 = vunpack.c.l.bf16 %v1029_v27  ;;  %v1039_v21 = vld [vmem:[%s1351_s27 + $0x78] sm:$0xff]  }
  0x45   : > { %v920_v44 = vunpack.c.h.bf16 %v1029_v27  ;;  %v951_v45 = vunpack.c.l.bf16 %v1037_v33  ;;  %v952_v46 = vunpack.c.h.bf16 %v1037_v33  ;;  %v983_v47 = vunpack.c.l.bf16 %v1045_v34 }
  0x46   : > { %1119 = vmatpush3.bf16.msra.mxu0 %v1118_v40  ;;  %v671_v48 = vadd.f32 %v670_v31, %v669_v41  ;;  %v676_v49 = vadd.f32 %v675_v37, %v674_v42  ;;  %v984_v50 = vunpack.c.h.bf16 %v1045_v34  ;;  %v1015_v51 = vunpack.c.l.bf16 %v1053_v39  ;;  %v1055_v31 = vld [vmem:[%s1351_s27 + $0xf8] sm:$0xff]  }
  0x47   : > { %1120 = vmatprep.subr.bf16.mxu0 %v1216_v32  ;;  %v1016_v53 = vunpack.c.h.bf16 %v1053_v39  ;;  %v679_v54 = vsel %vm478_vm1, %v919_v43, 0.0  ;;  %v680_v55 = vsel %vm478_vm1, %v951_v45, 0.0  ;;  %v682_v56 = vsel %vm478_vm1, %v983_v47, 0.0 }
  0x48   : > { %v678_v57 = vadd.f32 %v677_v38, %v676_v49  ;;  %v681_v58 = vadd.f32 %v680_v55, %v679_v54  ;;  %v684_v59 = vsel %vm478_vm1, %v1015_v51, 0.0  ;;  %v686_v60 = vsel %vm478_vm1, %v920_v44, 0.0 }
  0x49   : > { %v687_v63 = vsel %vm478_vm1, %v952_v46, 0.0  ;;  %v689_v0 = vsel %vm478_vm1, %v984_v50, 0.0  ;;  %v691_v1 = vsel %vm478_vm1, %v1016_v53, 0.0  ;;  %v923_v2 = vunpack.c.l.bf16 %v1030_v52 }
  0x4a   : > { %v1121_v4 = vpack.c.bf16 %v678_v57, %v671_v48  ;;  %v683_v5 = vadd.f32 %v682_v56, %v681_v58  ;;  %v688_v6 = vadd.f32 %v687_v63, %v686_v60  ;;  %v924_v7 = vunpack.c.h.bf16 %v1030_v52 }
  0x4b   : > { %v955_v8 = vunpack.c.l.bf16 %v1038_v61  ;;  %v956_v9 = vunpack.c.h.bf16 %v1038_v61  ;;  %v987_v10 = vunpack.c.l.bf16 %v1046_v62  ;;  %v988_v11 = vunpack.c.h.bf16 %v1046_v62  ;;  %v891_v62 = vld [vmem:[%s466_s6] ss:$0 sm:$0xff] }
  0x4c   : > { %1122 = vmatpush3.bf16.msra.mxu0 %v1121_v4  ;;  %v685_v12 = vadd.f32 %v684_v59, %v683_v5  ;;  %v690_v13 = vadd.f32 %v689_v0, %v688_v6  ;;  %v1019_v14 = vunpack.c.l.bf16 %v1054_v3  ;;  %v1020_v15 = vunpack.c.h.bf16 %v1054_v3 }
  0x4d   : > { %1123 = vmatprep.subr.bf16.mxu0 %v1216_v32  ;;  %v693_v17 = vsel %vm478_vm1, %v923_v2, 0.0  ;;  %v694_v18 = vsel %vm478_vm1, %v955_v8, 0.0  ;;  %v696_v19 = vsel %vm478_vm1, %v987_v10, 0.0  ;;  %v700_v20 = vsel %vm478_vm1, %v924_v7, 0.0 }
  0x4e   : > { %v692_v22 = vadd.f32 %v691_v1, %v690_v13  ;;  %v695_v23 = vadd.f32 %v694_v18, %v693_v17  ;;  %v698_v24 = vsel %vm478_vm1, %v1019_v14, 0.0  ;;  %v701_v25 = vsel %vm478_vm1, %v956_v9, 0.0  ;;  %v731_v1 = vld [vmem:[%s1370_s3] sm:$0xff] }
  0x4f   : > { %v702_v27 = vadd.f32 %v701_v25, %v700_v20  ;;  %v703_v28 = vsel %vm478_vm1, %v988_v11, 0.0  ;;  %v705_v29 = vsel %vm478_vm1, %v1020_v15, 0.0  ;;  %v927_v30 = vunpack.c.l.bf16 %v1031_v16 }
  0x50   : > { %v1124_v33 = vpack.c.bf16 %v692_v22, %v685_v12  ;;  %v697_v34 = vadd.f32 %v696_v19, %v695_v23  ;;  %v928_v35 = vunpack.c.h.bf16 %v1031_v16  ;;  %v959_v36 = vunpack.c.l.bf16 %v1039_v21 }
  0x51   : > { %v704_v37 = vadd.f32 %v703_v28, %v702_v27  ;;  %v960_v38 = vunpack.c.h.bf16 %v1039_v21  ;;  %v991_v39 = vunpack.c.l.bf16 %v1047_v26  ;;  %v992_v40 = vunpack.c.h.bf16 %v1047_v26 }
  0x52   : > { %1125 = vmatpush3.bf16.msra.mxu0 %v1124_v33  ;;  %v699_v41 = vadd.f32 %v698_v24, %v697_v34  ;;  %v1023_v42 = vunpack.c.l.bf16 %v1055_v31  ;;  %v1024_v43 = vunpack.c.h.bf16 %v1055_v31  ;;  %v707_v44 = vsel %vm478_vm1, %v927_v30, 0.0 }
  0x53   : > { %1126 = vmatprep.subr.bf16.mxu0 %v1216_v32  ;;  %v706_v45 = vadd.f32 %v705_v29, %v704_v37  ;;  %v708_v46 = vsel %vm478_vm1, %v959_v36, 0.0  ;;  %v710_v47 = vsel %vm478_vm1, %v991_v39, 0.0  ;;  %v714_v48 = vsel %vm478_vm1, %v928_v35, 0.0 }
  0x54   : > { %v709_v49 = vadd.f32 %v708_v46, %v707_v44  ;;  %v715_v50 = vsel %vm478_vm1, %v960_v38, 0.0  ;;  %v717_v51 = vsel %vm478_vm1, %v992_v40, 0.0  ;;  %v712_v53 = vsel %vm478_vm1, %v1023_v42, 0.0 }
  0x55   : > { %v1127_v52 = vpack.c.bf16 %v706_v45, %v699_v41  ;;  %v716_v54 = vadd.f32 %v715_v50, %v714_v48  ;;  %v722_v55 = vlaneseq  ;;  %v719_v57 = vsel %vm478_vm1, %v1024_v43, 0.0 }
  0x56   : > { %v711_v56 = vadd.f32 %v710_v47, %v709_v49  ;;  %v1219_v0 = vmov 1.0  }
  0x57   : > { %1128 = vmatpush3.bf16.msra.mxu0 %v1127_v52  ;;  %v718_v58 = vadd.f32 %v717_v51, %v716_v54  ;;  %v723_v61 = vshrl.u32 %v722_v55, 7 }
  0x58   : > { %1129 = vmatprep.subr.bf16.mxu0 %v1216_v32  ;;  %v713_v59 = vadd.f32 %v712_v53, %v711_v56 }
  0x59   : > { %v720_v60 = vadd.f32 %v719_v57, %v718_v58  ;;  %vm728_vm2 = vcmp.eq.s32.totalorder %v891_v62, %v723_v61 }
  0x5b   : > { %v1130_v63 = vpack.c.bf16 %v720_v60, %v713_v59 }
  0x5d   : > { %1131 = vmatpush3.bf16.msra.mxu0 %v1130_v63 }
  0x60   : > { %1106 = vmatmul.mubr.msk.f32.vlgmr.msra.gmra.mrb[0].mxu0 %vm728_vm2, %v1219_v0 }
 0x133   : > { %v798_v2 = vpop.f32.mrb[0].mxu0 }
 0x134   : > { %v802_v3 = vadd.f32 %v798_v2, %v731_v1  ;;  %v1107_v4 = vpop.f32.mrb[1].mxu0 }
 0x136   : > { %803 = vst.msk [vmem:[%s1370_s3] sm:$0xff] %vm478_vm1, %v802_v3 }
 0x137 PF: > { %s12_s13 = sadd.s32 1, %s1214_s13   ;;  %s1492_s9 = smov %s1202_s10 }
 0x138   : > { %p9_p10 = scmp.ge.s32.totalorder %s12_s13, 4   ;;  %s1493_s10 = smov %s1270_s17 }
 0x139   : > { %s1494_s11 = smov %s1210_s12  ;;  %s1495_s12 = smov %s1497_s14 }
 0x13a   :  { %11 = sbr.rel (!%p9_p10) target bundleno = 3 (0x3), region = 111 }

</bundles_post_ra>
